<compile_context>
chip_gen: v6e
topology: v6e:2x2x1
jax: 0.10.0
libtpu: 0.0.40
codegen_flags: <defaults>
</compile_context>

<pallas_src>
import jax
import jax.numpy as jnp
from jax.experimental import pallas as pl
from jax.experimental.pallas import tpu as pltpu


def _haar_col_pair_matrix(W: int, dtype=jnp.float32):
    """(W, W//2) matrix with 1.0 at [2j, j] and [2j+1, j]: sums adjacent column pairs."""
    cols = jnp.arange(W // 2)
    m = jnp.zeros((W, W // 2), dtype=dtype)
    m = m.at[2 * cols, cols].set(1.0)
    m = m.at[2 * cols + 1, cols].set(1.0)
    return m


def _dwt_ll_kernel(x_ref, m_ref, o_ref):
    # x_ref: (tr, 2W) block -- row r = [img_row_2k | img_row_2k+1]
    # m_ref: (W, W//2) constant pairing matrix
    # o_ref: (tr, W//2)
    w = m_ref.shape[0]
    x = x_ref[...].astype(jnp.float32)
    # Row low-pass (Haar): 0.5 * (row 2k + row 2k+1). Pure VPU; static lane slices.
    low = 0.5 * (x[:, :w] + x[:, w:])
    # Column low-pass: sum adjacent column pairs on the MXU.
    ll = jnp.dot(low, m_ref[...], preferred_element_type=jnp.float32)
    o_ref[...] = ll.astype(o_ref.dtype)


def _pick_row_tile(n_rows: int, row_bytes: int, target_bytes: int = 2 << 20) -> int:
    """Rows per block: ~target_bytes of input per buffer, multiple of 8 sublanes."""
    tr = max(8, (target_bytes // max(row_bytes, 1)) // 8 * 8)
    tr = min(tr, n_rows)
    # Keep >=2 grid steps when possible so the parallel axis can shard across
    # v7x's two TensorCores (neutral on single-TC v5e/v6e).
    if pl.cdiv(n_rows, tr) < 2 and n_rows >= 16:
        tr = max(8, ((n_rows // 2) // 8) * 8)
    return tr


def downsample_dwt_ll(x: jax.Array, wavename: str = "haar") -> jax.Array:
    """Pallas equivalent of Downsample(wavename='haar').forward.

    Args:
      x: (B, C, H, W) array (NCHW, same as PyTorch).
    Returns:
      (B, C, H//2, W//2) LL subband.
    """
    assert wavename == "haar", "only 'haar' supported in this synthetic kernel"
    B, C, H, W = x.shape
    assert H % 2 == 0 and W % 2 == 0

    n_rows = B * C * (H // 2)          # one row per output row
    x2 = x.reshape(n_rows, 2 * W)      # free reshape of contiguous NCHW memory
    m = _haar_col_pair_matrix(W, jnp.float32)

    itemsize = x.dtype.itemsize
    tr = _pick_row_tile(n_rows, 2 * W * itemsize)
    grid = (pl.cdiv(n_rows, tr),)

    # VMEM budget: double-buffered in/out blocks + constant matrix + temporaries.
    est = (2 * tr * 2 * W * itemsize          # input blocks (x2 buffers)
           + 2 * tr * (W // 2) * itemsize     # output blocks (x2 buffers)
           + 2 * W * (W // 2) * 4             # pairing matrix (x2 buffers)
           + 3 * tr * 2 * W * 4)              # in-kernel f32 temporaries
    vmem_limit = int(min(48 * 1024 * 1024, max(8 * 1024 * 1024, 2 * est)))

    # Memory-bound cost hint for XLA's scheduler.
    flops = n_rows * W + 2 * n_rows * W * (W // 2)
    bytes_accessed = (n_rows * 2 * W * itemsize
                      + n_rows * (W // 2) * itemsize
                      + W * (W // 2) * 4)
    cost = pl.CostEstimate(flops=flops, transcendentals=0,
                           bytes_accessed=bytes_accessed)

    out2 = pl.pallas_call(
        _dwt_ll_kernel,
        out_shape=jax.ShapeDtypeStruct((n_rows, W // 2), x.dtype),
        grid_spec=pltpu.PrefetchScalarGridSpec(
            num_scalar_prefetch=0,
            grid=grid,
            in_specs=[
                pl.BlockSpec((tr, 2 * W), lambda i: (i, 0)),
                # Constant index map: the matrix is DMA'd only once across steps.
                pl.BlockSpec((W, W // 2), lambda i: (0, 0)),
            ],
            out_specs=pl.BlockSpec((tr, W // 2), lambda i: (i, 0)),
        ),
        compiler_params=pltpu.CompilerParams(
            dimension_semantics=("parallel",),
            vmem_limit_bytes=vmem_limit,
        ),
        cost_estimate=cost,
    )(x2, m)

    return out2.reshape(B, C, H // 2, W // 2)


def _reference_dwt_ll(x: jax.Array) -> jax.Array:
    # Pure-JAX reference for the Haar LL subband.
    return 0.5 * (x[..., ::2, ::2] + x[..., ::2, 1::2]
                  + x[..., 1::2, ::2] + x[..., 1::2, 1::2])


if __name__ == "__main__":
    key = jax.random.PRNGKey(0)

    # Primary test shape (matches the module spec example).
    B, C, H, W = 2, 4, 16, 16
    x = jax.random.normal(key, (B, C, H, W), dtype=jnp.float32)
    out = downsample_dwt_ll(x)
    out = jax.block_until_ready(out)
    ref = _reference_dwt_ll(x)
    assert out.shape == (B, C, H // 2, W // 2), out.shape
    assert jnp.allclose(out, ref, atol=1e-5, rtol=1e-5), "mismatch vs reference (16x16)"

    # Second shape: exercises a multi-step grid and a wider (lane-dense) image.
    key2 = jax.random.PRNGKey(0)
    x2 = jax.random.normal(key2, (1, 2, 32, 128), dtype=jnp.float32)
    out2 = jax.block_until_ready(downsample_dwt_ll(x2))
    ref2 = _reference_dwt_ll(x2)
    assert out2.shape == (1, 2, 16, 64), out2.shape
    assert jnp.allclose(out2, ref2, atol=1e-5, rtol=1e-5), "mismatch vs reference (32x128)"

    print("KERNEL_OK")
</pallas_src>

<mosaic_0001>
module attributes {stable_mosaic.version = 11 : i64} {
  func.func @_dwt_ll_kernel(%arg0: i32, %arg1: memref<32x32xf32, #tpu.memory_space<vmem>>, %arg2: memref<16x8xf32, #tpu.memory_space<vmem>>, %arg3: memref<32x8xf32, #tpu.memory_space<vmem>>) attributes {dimension_semantics = [#tpu.dimension_semantics<parallel>], iteration_bounds = array<i64: 2>, scalar_prefetch = 0 : i64, scratch_operands = 0 : i64, tpu.core_type = #tpu.core_type<tc>, window_params = [{transform_indices = @transform_0, window_bounds = array<i64: 32, 32>}, {pipeline_mode = #tpu.pipeline_mode<synchronous>, transform_indices = @transform_1, window_bounds = array<i64: 16, 8>}, {transform_indices = @transform_2, window_bounds = array<i64: 32, 8>}]} {
    %c0 = arith.constant 0 : index
    %c0_0 = arith.constant 0 : index
    %0 = vector.load %arg1[%c0, %c0_0] : memref<32x32xf32, #tpu.memory_space<vmem>>, vector<32x32xf32>
    %1 = vector.extract_strided_slice %0 {offsets = [0, 0], sizes = [32, 16], strides = [1, 1]} : vector<32x32xf32> to vector<32x16xf32>
    %2 = vector.extract_strided_slice %0 {offsets = [0, 16], sizes = [32, 16], strides = [1, 1]} : vector<32x32xf32> to vector<32x16xf32>
    %3 = arith.addf %1, %2 : vector<32x16xf32>
    %cst = arith.constant 5.000000e-01 : f32
    %4 = vector.broadcast %cst : f32 to vector<32x16xf32>
    %5 = arith.mulf %4, %3 : vector<32x16xf32>
    %c0_1 = arith.constant 0 : index
    %c0_2 = arith.constant 0 : index
    %6 = vector.load %arg2[%c0_1, %c0_2] : memref<16x8xf32, #tpu.memory_space<vmem>>, vector<16x8xf32>
    %cst_3 = arith.constant dense<0.000000e+00> : vector<32x8xf32>
    %7 = tpu.matmul %5, %6, %cst_3 {dimension_numbers = #tpu.dot_dimension_numbers<[1], [0], [0], [1], [0, 0, 1, 1], [], []>} : vector<32x16xf32>, vector<16x8xf32>, vector<32x8xf32> -> vector<32x8xf32>
    %c0_4 = arith.constant 0 : index
    %c0_5 = arith.constant 0 : index
    %8 = vector.load %arg3[%c0_4, %c0_5] : memref<32x8xf32, #tpu.memory_space<vmem>>, vector<32x8xf32>
    tpu.vector_store %arg3[%c0_4, %c0_5], %7 {strides = array<i32>} : memref<32x8xf32, #tpu.memory_space<vmem>>, vector<32x8xf32>,
    return
  }
  func.func @transform_0(%arg0: i32) -> (i32, i32) {
    %c0_i32 = arith.constant 0 : i32
    %c0_i32_0 = arith.constant 0 : i32
    return %arg0, %c0_i32 : i32, i32
  }
  func.func @transform_1(%arg0: i32) -> (i32, i32) {
    %c0_i32 = arith.constant 0 : i32
    %c0_i32_0 = arith.constant 0 : i32
    %c0_i32_1 = arith.constant 0 : i32
    return %c0_i32, %c0_i32_0 : i32, i32
  }
  func.func @transform_2(%arg0: i32) -> (i32, i32) {
    %c0_i32 = arith.constant 0 : i32
    %c0_i32_0 = arith.constant 0 : i32
    return %arg0, %c0_i32 : i32, i32
  }
}

</mosaic_0001>

<bundles_post_ra>
// kernel: tpu_custom_call.1
= control target key start
LH: loop header
LB: loop body
LE: loop exit
PB: predicated region body
PF: predicated region fallthrough
CT: control target
= control target key end

     0   :  { %s404_s9 = smov 0   ;;  %s434_s0 = inlined_call_operand.vmem [shape: f32[64,32], index: 0, kind: input, shape index: {}]   ;;  %s435_s1 = inlined_call_operand.vmem [shape: f32[16,8], index: 1, kind: input, shape index: {}]   ;;  %s436_s2 = inlined_call_operand.vmem [shape: f32[64,8], index: 2, kind: output, shape index: {}]  }
   0x1 LB: > { %s336_s10 = sadd.s32 4294967295, %s386_s9   ;;  %p340_p0 = scmp.ge.s32.totalorder %s386_s9, 1  ;;  %s386_s9 = sphi %s404_s9, %s12_s9  }
   0x2   : > { %p113_p1 = scmp.lt.s32.totalorder %s386_s9, 3 }
   0x4   : > { %p114_p2 = pnand %p340_p0, %p113_p1 }
   0x5   : > { %s341_s11 = sshll.u32 (!%p114_p2), %s336_s10, 2  ;;  %s388_s20 = smov (!%p114_p2), 112  }
   0x6   : > { %117 = sbr.rel (%p114_p2) target bundleno = 335 (0x14f), region = 28  ;;  %p136_p3 = scmp.lt.s32.totalorder (!%p114_p2), %s341_s11, 7 }
   0xb   : > { %v176_v0 = vld [vmem:[%s435_s1 + $0x8] sm:$0xff]  ;;  %v175_v1 = vld [vmem:[%s435_s1] sm:$0xff]  ;;  %s438_s11 = smov (!%p136_p3, %s341_s11), 7  ;;  %vm177_vm0 = vcmask 130048   ;;  %vm275_vm1 = vcmask 64512  }
   0xc   : > { %357 = vmatprep.subr.mxu0 %v176_v0  ;;  %367 = vmatprep.subr.mxu1 %v176_v0  ;;  %s342_s16 = sshll.u32 %s438_s11, 3 }
   0xd   : > { %358 = vmatpush3.msra.mxu0 %v176_v0  ;;  %369 = vmatpush3.msra.mxu1 %v176_v0  ;;  %s139_s19 = scalar_lea.vmem %s434_s0, %s342_s16  ;;  %s145_s23 = scalar_lea.vmem %s436_s2, %s342_s16 }
   0xe   : > { %359 = vmatprep.subr.mxu0 %v175_v1  ;;  %368 = vmatprep.subr.mxu1 %v175_v1  ;;  %v149_v2 = vld [vmem:[%s139_s19 + $0x10] sm:$0xff]  ;;  %v147_v3 = vld [vmem:[%s139_s19] sm:$0xff]  ;;  %v150_v4 = vld [vmem:[%s139_s19 + $0x18] sm:$0xff] }
   0xf   : > { %360 = vmatpush3.msra.mxu0 %v175_v1  ;;  %370 = vmatpush3.msra.mxu1 %v175_v1  ;;  %v148_v5 = vld [vmem:[%s139_s19 + $0x8] sm:$0xff] }
  0x10   : > { %159 = vrot.lane.b32.xlu1 %v149_v2, %s388_s20  ;;  %155 = vrot.lane.b32.xlu0 %v147_v3, %s388_s20 }
  0x14   : > { %161 = vrot.lane.b32.xlu1 %v150_v4, %s388_s20  ;;  %157 = vrot.lane.b32.xlu0 %v148_v5, %s388_s20 }
  0x82   : > { %v160_v6 = vpop.permute.xlu1 %159  ;;  %v156_v7 = vpop.permute.xlu0 %155 }
  0x83   : > { %v169_v8 = vadd.f32 %v160_v6, %v149_v2  ;;  %v167_v9 = vadd.f32 %v156_v7, %v147_v3 }
  0x85   : > { %v173_v10 = vmul.f32 0.5, %v169_v8  ;;  %v171_v11 = vmul.f32 0.5, %v167_v9 }
  0x86   : > { %v162_v12 = vpop.permute.xlu1 %161  ;;  %v158_v13 = vpop.permute.xlu0 %157 }
  0x87   : > { %v170_v14 = vadd.f32 %v162_v12, %v150_v4  ;;  %v168_v15 = vadd.f32 %v158_v13, %v148_v5  ;;  %361 = vmatprep.mubr.msk.f32.mxu0 %vm177_vm0, %v171_v11  ;;  %364 = vmatprep.mubr.msk.f32.mxu1 %vm177_vm0, %v173_v10 }
  0x89   : > { %v174_v16 = vmul.f32 0.5, %v170_v14  ;;  %v172_v17 = vmul.f32 0.5, %v168_v15 }
  0x8b   : > { %362 = vmatmul.mubr.msk.f32.vlgmr.msra.gmra.mxu0 %vm177_vm0, %v172_v17  ;;  %365 = vmatmul.mubr.msk.f32.vlgmr.msra.gmra.mxu1 %vm177_vm0, %v174_v16 }
 0x14b   : > { %v363_v18 = vpop.f32.mrf.mxu0  ;;  %v366_v19 = vpop.f32.mrf.mxu1 }
 0x14c   : > { %277 = vst.msk [vmem:[%s145_s23 + $0x8] sm:$0xff] %vm275_vm1, %v363_v18  ;;  %279 = vst.msk [vmem:[%s145_s23 + $0x18] sm:$0xff] %vm275_vm1, %v366_v19 }
 0x14d   : > { %v256_v20 = vpop.f32.mrf.mxu0  ;;  %v266_v21 = vpop.f32.mrf.mxu1 }
 0x14e   : > { %276 = vst.msk [vmem:[%s145_s23] sm:$0xff] %vm275_vm1, %v256_v20  ;;  %278 = vst.msk [vmem:[%s145_s23 + $0x10] sm:$0xff] %vm275_vm1, %v266_v21 }
 0x14f PF: > { %s12_s9 = sadd.s32 1, %s386_s9  }
 0x150   : > { %p9_p4 = scmp.ge.s32.totalorder %s12_s9, 4  }
 0x152   :  { %11 = sbr.rel (!%p9_p4) target bundleno = 1 (0x1), region = 58 }

</bundles_post_ra>
